<compile_context>
chip_gen: v5e
topology: v5e:2x2
jax: 0.10.0
libtpu: 0.0.40
codegen_flags: <defaults>
</compile_context>

<pallas_src>
import jax
import jax.numpy as jnp
from jax.experimental import pallas as pl
from jax.experimental.pallas import tpu as pltpu


def _round_up(x, m):
    return ((x + m - 1) // m) * m


# ---------------- kernels ----------------

def _iht_kernel_single_k(a_ref, v_ref, o_ref):
    """Whole K in one tile: no accumulator scratch needed."""
    a = jnp.maximum(a_ref[...], 0.0).astype(v_ref.dtype)
    o_ref[...] = jnp.dot(a, v_ref[...], preferred_element_type=jnp.float32).astype(
        o_ref.dtype
    )


def _iht_kernel_accum(a_ref, v_ref, o_ref, acc_ref):
    """Multi-step K reduction with a resident f32 accumulator."""
    @pl.when(pl.program_id(2) == 0)
    def _():
        acc_ref[...] = jnp.zeros_like(acc_ref)

    a = jnp.maximum(a_ref[...], 0.0).astype(v_ref.dtype)
    acc_ref[...] += jnp.dot(a, v_ref[...], preferred_element_type=jnp.float32)

    @pl.when(pl.program_id(2) == pl.num_programs(2) - 1)
    def _():
        o_ref[...] = acc_ref[...].astype(o_ref.dtype)


# ---------------- wrapper ----------------

_VMEM_BUDGET_BYTES = 24 * 1024 * 1024   # tile working set (double-buffered)
_VMEM_LIMIT_BYTES = 40 * 1024 * 1024    # safe on v5e/v6e (128 MiB) and v7x (64 MiB)


def _pick_tk(tm, tn, K128, v_itemsize):
    """Largest tk (multiple of 128) whose double-buffered working set fits."""
    fixed = 2 * tm * tn * 4 + tm * tn * 4          # out (x2) + acc
    tk = min(K128, 8192)
    while tk > 128:
        use = fixed + 2 * tm * tk * 4 + 2 * tk * tn * v_itemsize
        if use <= _VMEM_BUDGET_BYTES:
            break
        tk -= 128
    return max(128, (tk // 128) * 128)


def iht_matmul(a, v):
    """relu(a) @ v via a tiled Pallas TPU kernel.

    a: (M, K) float32, v: (K, N) (typically bfloat16) -> (M, N) float32.
    Shapes need not be tile-aligned; the wrapper zero-pads and slices.
    """
    M, K = a.shape
    K2, N = v.shape
    assert K == K2
    v_itemsize = jnp.dtype(v.dtype).itemsize

    # M = B*C is usually small: keep it in a single resident block if possible.
    M8 = _round_up(M, 8)
    tm = M8 if M8 <= 256 else 256
    Mp = _round_up(M, tm)

    # Wide, lane-dense N tiles.
    N128 = _round_up(N, 128)
    tn = min(512, N128)
    # If M collapsed to one block, keep >= 2 N blocks so both cores get work.
    if Mp // tm == 1 and 256 <= N128 <= tn:
        tn = _round_up(N128 // 2, 128)
    Np = _round_up(N, tn)

    # K tile: as large as the VMEM budget allows (full-K preferred -> no acc).
    K128 = _round_up(K, 128)
    tk = _pick_tk(tm, tn, K128, v_itemsize)
    if K128 <= tk:
        tk = K128
    Kp = _round_up(K, tk)

    # Zero-pad to tile multiples (relu(0)=0; zero V rows/cols are inert).
    a_p = a if (Mp == M and Kp == K) else jnp.pad(a, ((0, Mp - M), (0, Kp - K)))
    v_p = v if (Kp == K and Np == N) else jnp.pad(v, ((0, Kp - K), (0, Np - N)))

    single_k = (Kp // tk) == 1

    if single_k:
        grid = (Mp // tm, Np // tn)
        out = pl.pallas_call(
            _iht_kernel_single_k,
            out_shape=jax.ShapeDtypeStruct((Mp, Np), jnp.float32),
            grid_spec=pltpu.PrefetchScalarGridSpec(
                num_scalar_prefetch=0,
                grid=grid,
                in_specs=[
                    pl.BlockSpec((tm, tk), lambda i, j: (i, 0)),
                    pl.BlockSpec((tk, tn), lambda i, j: (0, j)),
                ],
                out_specs=pl.BlockSpec((tm, tn), lambda i, j: (i, j)),
            ),
            compiler_params=pltpu.CompilerParams(
                dimension_semantics=("parallel", "parallel"),
                vmem_limit_bytes=_VMEM_LIMIT_BYTES,
            ),
        )(a_p, v_p)
    else:
        grid = (Mp // tm, Np // tn, Kp // tk)
        out = pl.pallas_call(
            _iht_kernel_accum,
            out_shape=jax.ShapeDtypeStruct((Mp, Np), jnp.float32),
            grid_spec=pltpu.PrefetchScalarGridSpec(
                num_scalar_prefetch=0,
                grid=grid,
                in_specs=[
                    pl.BlockSpec((tm, tk), lambda i, j, k: (i, k)),
                    pl.BlockSpec((tk, tn), lambda i, j, k: (k, j)),
                ],
                out_specs=pl.BlockSpec((tm, tn), lambda i, j, k: (i, j)),
                scratch_shapes=[pltpu.VMEM((tm, tn), jnp.float32)],
            ),
            compiler_params=pltpu.CompilerParams(
                dimension_semantics=("parallel", "parallel", "arbitrary"),
                vmem_limit_bytes=_VMEM_LIMIT_BYTES,
            ),
        )(a_p, v_p)

    if Mp != M or Np != N:
        out = out[:M, :N]
    return out


class IHT:
    """JAX/Pallas re-implementation of the PyTorch IHT module."""

    def __init__(self, vote_index, compute_dtype=jnp.bfloat16):
        # vote_index: (r, c, h, w)
        self.r, self.c, self.h, self.w = vote_index.shape
        V = jnp.reshape(vote_index, (self.r * self.c, self.h * self.w)).T
        # bf16 is exactly lossless for a 0/1 vote matrix and halves the
        # dominant (memory-bound) HBM stream.
        self.vote_index = V.astype(compute_dtype)

    def __call__(self, input_HT):
        # input_HT: (B, C, h, w) NCHW
        batch, channel, H, W = input_HT.shape
        assert H * W == self.h * self.w
        a = jnp.reshape(input_HT, (batch * channel, self.h * self.w)).astype(
            jnp.float32
        )
        y = iht_matmul(a, self.vote_index)  # ReLU fused inside the kernel
        return jnp.reshape(y, (batch, channel, self.r, self.c))


def _reference(input_HT, vote_index, compute_dtype=jnp.float32):
    r, c, h, w = vote_index.shape
    V = jnp.reshape(vote_index, (r * c, h * w)).T.astype(compute_dtype).astype(
        jnp.float32
    )
    b, ch, _, _ = input_HT.shape
    a = (
        jnp.maximum(input_HT, 0.0)
        .reshape(b * ch, h * w)
        .astype(compute_dtype)
        .astype(jnp.float32)
    )
    return (a @ V).reshape(b, ch, r, c)


if __name__ == "__main__":
    key = jax.random.PRNGKey(0)
    k1, k2 = jax.random.split(key)

    # Small shapes: h*w = 256 (K), r*c = 128 (N), B*C = 8 (M).
    batch, channel = 2, 4
    r, c, h, w = 8, 16, 16, 16

    # Deterministic synthetic vote index (sparse binary voting pattern).
    vote_index = (
        jax.random.uniform(k1, (r, c, h, w), dtype=jnp.float32) < 0.1
    ).astype(jnp.float32)

    x = jax.random.normal(k2, (batch, channel, h, w), dtype=jnp.float32)

    module = IHT(vote_index)
    out = module(x)
    out = jax.block_until_ready(out)
    assert out.shape == (batch, channel, r, c)

    # Tight check against the bf16-compute reference (same quantization).
    ref_bf16 = _reference(x, vote_index, compute_dtype=jnp.bfloat16)
    assert jnp.allclose(out, ref_bf16, atol=1e-3, rtol=1e-3)

    # Loose check against the pure-f32 PyTorch-equivalent reference
    # (bf16 LHS rounding only; V is 0/1 so exact in bf16).
    ref_f32 = _reference(x, vote_index, compute_dtype=jnp.float32)
    assert jnp.allclose(out, ref_f32, atol=5e-2, rtol=5e-2)

    print("KERNEL_OK")
</pallas_src>

<mosaic_0001>
module attributes {stable_mosaic.version = 11 : i64} {
  func.func @_iht_kernel_single_k(%arg0: i32, %arg1: i32, %arg2: memref<8x256xf32, #tpu.memory_space<vmem>>, %arg3: memref<256x128xbf16, #tpu.memory_space<vmem>>, %arg4: memref<8x128xf32, #tpu.memory_space<vmem>>) attributes {dimension_semantics = [#tpu.dimension_semantics<parallel>, #tpu.dimension_semantics<parallel>], iteration_bounds = array<i64: 1, 1>, scalar_prefetch = 0 : i64, scratch_operands = 0 : i64, tpu.core_type = #tpu.core_type<tc>, window_params = [{transform_indices = @transform_0, window_bounds = array<i64: 8, 256>}, {transform_indices = @transform_1, window_bounds = array<i64: 256, 128>}, {transform_indices = @transform_2, window_bounds = array<i64: 8, 128>}]} {
    %c0 = arith.constant 0 : index
    %c0_0 = arith.constant 0 : index
    %0 = vector.load %arg2[%c0, %c0_0] : memref<8x256xf32, #tpu.memory_space<vmem>>, vector<8x256xf32>
    %cst = arith.constant 0.000000e+00 : f32
    %1 = vector.broadcast %cst : f32 to vector<8x256xf32>
    %2 = arith.maximumf %0, %1 : vector<8x256xf32>
    %3 = arith.truncf %2 : vector<8x256xf32> to vector<8x256xbf16>
    %c0_1 = arith.constant 0 : index
    %c0_2 = arith.constant 0 : index
    %4 = vector.load %arg3[%c0_1, %c0_2] : memref<256x128xbf16, #tpu.memory_space<vmem>>, vector<256x128xbf16>
    %cst_3 = arith.constant dense<0.000000e+00> : vector<8x128xf32>
    %5 = tpu.matmul %3, %4, %cst_3 {dimension_numbers = #tpu.dot_dimension_numbers<[1], [0], [0], [1], [0, 0, 1, 1], [], []>} : vector<8x256xbf16>, vector<256x128xbf16>, vector<8x128xf32> -> vector<8x128xf32>
    %c0_4 = arith.constant 0 : index
    %c0_5 = arith.constant 0 : index
    %6 = vector.load %arg4[%c0_4, %c0_5] : memref<8x128xf32, #tpu.memory_space<vmem>>, vector<8x128xf32>
    tpu.vector_store %arg4[%c0_4, %c0_5], %5 {strides = array<i32>} : memref<8x128xf32, #tpu.memory_space<vmem>>, vector<8x128xf32>,
    return
  }
  func.func @transform_0(%arg0: i32, %arg1: i32) -> (i32, i32) {
    %c0_i32 = arith.constant 0 : i32
    %c0_i32_0 = arith.constant 0 : i32
    return %arg0, %c0_i32 : i32, i32
  }
  func.func @transform_1(%arg0: i32, %arg1: i32) -> (i32, i32) {
    %c0_i32 = arith.constant 0 : i32
    %c0_i32_0 = arith.constant 0 : i32
    return %c0_i32, %arg1 : i32, i32
  }
  func.func @transform_2(%arg0: i32, %arg1: i32) -> (i32, i32) {
    %c0_i32 = arith.constant 0 : i32
    return %arg0, %arg1 : i32, i32
  }
}

</mosaic_0001>

<bundles_post_ra>
// kernel: tpu_custom_call.1
= control target key start
LH: loop header
LB: loop body
LE: loop exit
PB: predicated region body
PF: predicated region fallthrough
CT: control target
= control target key end

     0   :  { %7 = vsyncpa [#allocation3], 0  ;;  %s413_s0 = inlined_call_operand.hbm [shape: f32[8,256], index: 0, kind: input, shape index: {}]   ;;  %s414_s1 = inlined_call_operand.hbm [shape: bf16[256,128], index: 1, kind: input, shape index: {}]   ;;  %s415_s2 = inlined_call_operand.hbm [shape: f32[8,128], index: 2, kind: output, shape index: {}]  }
   0x1   :  { %8 = vsyncpa [#allocation6], 0 }
   0x2   :  { %9 = vsyncpa [#allocation4], 0  ;;  %s15_s11 = sshll.u32 %s413_s0, 4  ;;  %s384_s12 = smov [#allocation2]   ;;  %s16_s11 = int_to_ptr.hbm [resolvable:$true] %s15_s11 }
   0x3   :  { %s17_s13 = sshll.u32 %s384_s12, 4  ;;  %s25_s16 = sshll.u32 %s414_s1, 4  ;;  %s18_s13 = int_to_ptr.vmem [resolvable:$true] %s17_s13  ;;  %s26_s16 = int_to_ptr.hbm [resolvable:$true] %s25_s16 }
   0x4   :  { %20 = dma.hbm_to_vmem [thread:$0]  %s16_s11, 256, %s18_s13, [#allocation3]  }
   0x5   :  { %s385_s17 = smov [#allocation5]   ;;  %s386_s19 = smov 64  }
   0x6   :  { %s27_s18 = sshll.u32 %s385_s17, 4  ;;  %s387_s20 = smov 4   ;;  %s28_s18 = int_to_ptr.vmem [resolvable:$true] %s27_s18 }
   0x7   :  { %33 = dma.hbm_to_vmem [thread:$0]  %s26_s16, 2048, %s28_s18, [#allocation6], %s386_s19, %s386_s19, %s387_s20  }
   0x8   :  { %378 = dma.done.wait [#allocation3], 256  }
   0x9   :  { %379 = vsyncadd [#allocation3], 4294967040 }
   0xa   :  { %380 = dma.done.wait [#allocation6], 2048  }
   0xb   :  { %381 = vsyncadd [#allocation6], 4294965248  ;;  %v292_v0 = vld [vmem:[#allocation5 + $0x38] sm:$0xff]  ;;  %v291_v2 = vld [vmem:[#allocation5 + $0x30] sm:$0xff]  ;;  %s388_s0 = smov [#allocation7]   ;;  %s210_s23 = sshll.u32 %s415_s2, 4  ;;  %s211_s23 = int_to_ptr.hbm [resolvable:$true] %s210_s23 }
   0xc   :  { %v300_v1 = vld [vmem:[#allocation5 + $0x78] sm:$0xff]  ;;  %176 = vmatpush.bf16.msra.mxu0 %v292_v0  ;;  %v299_v3 = vld [vmem:[#allocation5 + $0x70] sm:$0xff]  ;;  %v290_v4 = vld [vmem:[#allocation5 + $0x28] sm:$0xff]  ;;  %s208_s1 = sshll.u32 %s388_s0, 4  ;;  %s209_s1 = int_to_ptr.vmem [resolvable:$true] %s208_s1 }
   0xd   :  { %189 = vmatpush.bf16.msra.mxu1 %v300_v1  ;;  %v298_v5 = vld [vmem:[#allocation5 + $0x68] sm:$0xff]  ;;  %v289_v6 = vld [vmem:[#allocation5 + $0x20] sm:$0xff]  ;;  %v288_v8 = vld [vmem:[#allocation5 + $0x18] sm:$0xff] }
   0xe   :  { %v297_v7 = vld [vmem:[#allocation5 + $0x60] sm:$0xff]  ;;  %v296_v9 = vld [vmem:[#allocation5 + $0x58] sm:$0xff]  ;;  %v287_v10 = vld [vmem:[#allocation5 + $0x10] sm:$0xff] }
   0xf   :  { %v295_v11 = vld [vmem:[#allocation5 + $0x50] sm:$0xff]  ;;  %v286_v12 = vld [vmem:[#allocation5 + $0x8] sm:$0xff]  ;;  %v43_v15 = vld [vmem:[#allocation2 + $0x8] sm:$0xff] }
  0x10   :  { %177 = vmatpush.bf16.msra.mxu0 %v291_v2  ;;  %v294_v13 = vld [vmem:[#allocation5 + $0x48] sm:$0xff]  ;;  %v42_v14 = vld [vmem:[#allocation2] sm:$0xff]  ;;  %v45_v17 = vmax.f32 %v43_v15, 0.0  ;;  %v285_v18 = vld [vmem:[#allocation5] sm:$0xff] }
  0x11   :  { %190 = vmatpush.bf16.msra.mxu1 %v299_v3  ;;  %v44_v16 = vmax.f32 %v42_v14, 0.0  ;;  %v293_v19 = vld [vmem:[#allocation5 + $0x40] sm:$0xff] }
  0x12   :  { %v47_v21 = vpack.c.bf16 %v45_v17, %v45_v17 }
  0x13   :  { %v46_v20 = vpack.c.bf16 %v44_v16, %v44_v16 }
  0x14   :  { %178 = vmatpush.bf16.msra.mxu0 %v290_v4 }
  0x15   :  { %191 = vmatpush.bf16.msra.mxu1 %v298_v5 }
  0x18   :  { %179 = vmatpush.bf16.msra.mxu0 %v289_v6 }
  0x19   :  { %192 = vmatpush.bf16.msra.mxu1 %v297_v7 }
  0x1c   :  { %180 = vmatpush.bf16.msra.mxu0 %v288_v8 }
  0x1d   :  { %193 = vmatpush.bf16.msra.mxu1 %v296_v9 }
  0x20   :  { %181 = vmatpush.bf16.msra.mxu0 %v287_v10 }
  0x21   :  { %194 = vmatpush.bf16.msra.mxu1 %v295_v11 }
  0x24   :  { %182 = vmatpush.bf16.msra.mxu0 %v286_v12 }
  0x25   :  { %195 = vmatpush.bf16.msra.mxu1 %v294_v13 }
  0x28   :  { %183 = vmatpush.bf16.msra.mxu0 %v285_v18 }
  0x29   :  { %196 = vmatpush.bf16.msra.mxu1 %v293_v19 }
  0x2b   :  { %184 = vmatmul.bf16.vlgmr.msra.gmra.mxu0 %v46_v20 }
  0x2c   :  { %197 = vmatmul.bf16.vlgmr.msra.gmra.mxu1 %v47_v21 }
  0xa8   :  { %v185_v22 = vpop.f32.mrf.mxu0 }
  0xa9   :  { %v198_v23 = vpop.f32.mrf.mxu1 }
  0xaa   :  { %v199_v24 = vadd.f32 %v198_v23, %v185_v22 }
  0xac   :  { %202 = vst [vmem:[#allocation7] sm:$0xff] %v199_v24 }
  0xad   :  { %213 = dma.vmem_to_hbm [thread:$0]  %s209_s1, 128, %s211_s23, [#allocation4]  }
  0xb0   :  { %v187_v25 = vpop.f32.mrf.mxu0 }
  0xb1   :  { %v200_v26 = vpop.f32.mrf.mxu1 }
  0xb2   :  { %382 = dma.done.wait [#allocation4], 128  }
  0xb3   :  { %383 = vsyncadd [#allocation4], 4294967168 }
  0xb4   :  { %218 = vsyncpa [#allocation3], 1 }
  0xb5   :  { %219 = vsyncpa [#allocation6], 1 }
  0xb6   :  { %220 = vsyncpa [#allocation4], 1 }

</bundles_post_ra>
